<compile_context>
chip_gen: v5e
topology: v5e:2x2
jax: 0.10.0
libtpu: 0.0.40
codegen_flags: <defaults>
</compile_context>

<pallas_src>
import jax
import jax.numpy as jnp
from jax import lax
from jax.experimental import pallas as pl
from jax.experimental.pallas import tpu as pltpu


def _random_signal_kernel(x_ref, bits_ref, out_ref):
    TB, D = x_ref.shape
    S = out_ref.shape[1] - D          # signal_dim
    Sh = bits_ref.shape[1] // 2       # half-width: one Box-Muller pair -> 2 cols

    # ---- concat part 1: copy x into the first D feature columns ----
    out_ref[:, :D] = x_ref[...]

    # ---- concat part 2: Box-Muller normal from raw uniform bits ----
    # Bit-trick uniform: (bits >> 9) | 0x3F800000 bitcast to f32 lies in [1, 2).
    exp_one = jnp.uint32(0x3F800000)
    v1 = lax.bitcast_convert_type((bits_ref[:, :Sh] >> 9) | exp_one, jnp.float32)
    v2 = lax.bitcast_convert_type((bits_ref[:, Sh:] >> 9) | exp_one, jnp.float32)

    u1 = 2.0 - v1                     # in (0, 1]  -> safe for log (tail ~5.6 sigma)
    u2 = v2 - 1.0                     # in [0, 1)

    two_pi = jnp.float32(2.0 * 3.14159265358979)
    r = jnp.sqrt(-2.0 * jnp.log(u1))
    theta = two_pi * u2
    z1 = r * jnp.cos(theta)           # both Box-Muller outputs are used:
    z2 = r * jnp.sin(theta)           # halves EUP (log/sqrt/trig) and bit volume

    out_ref[:, D:D + Sh] = z1.astype(out_ref.dtype)
    if S - Sh > 0:                    # static (trace-time) condition; odd S drops 1 col
        out_ref[:, D + Sh:D + S] = z2[:, :S - Sh].astype(out_ref.dtype)


def _pick_tile_b(B, D, S, Sh):
    """Largest batch tile (multiple of 8) that keeps double-buffered tiles small."""
    vmem_budget = 8 * 1024 * 1024                     # far under v7x 32 MiB scoped
    row_bytes = 4 * (D + 2 * Sh + (D + S))            # x + bits + out rows (<=4B/elem)
    max_rows = max(8, vmem_budget // (2 * row_bytes)) # x2 for double buffering
    tile = max(8, min(1024, (max_rows // 8) * 8))
    return B if B <= tile else tile


def random_signal(x, signal_dim, key):
    """Pallas equivalent of RandomSignal(signal_dim)(x); deterministic via `key`."""
    B, D = x.shape
    S = int(signal_dim)
    Sh = (S + 1) // 2

    # Raw uniform bits for the whole batch (single key -> unique per row/tile).
    bits = jax.random.bits(key, (B, 2 * Sh), dtype=jnp.uint32)

    TILE_B = _pick_tile_b(B, D, S, Sh)
    grid = (pl.cdiv(B, TILE_B),)

    return pl.pallas_call(
        _random_signal_kernel,
        out_shape=jax.ShapeDtypeStruct((B, D + S), x.dtype),
        grid=grid,
        in_specs=[
            pl.BlockSpec((TILE_B, D), lambda i: (i, 0)),        # x tile
            pl.BlockSpec((TILE_B, 2 * Sh), lambda i: (i, 0)),   # uniform bits tile
        ],
        out_specs=pl.BlockSpec((TILE_B, D + S), lambda i: (i, 0)),
        compiler_params=pltpu.CompilerParams(
            dimension_semantics=("parallel",),                  # megacore on v7x
            vmem_limit_bytes=32 * 1024 * 1024,
        ),
    )(x, bits)


if __name__ == "__main__":
    key = jax.random.PRNGKey(0)
    kx, ksig = jax.random.split(key)

    B, D = 2, 16
    signal_dim = 8

    x = jax.random.normal(kx, (B, D), dtype=jnp.float32)

    out = random_signal(x, signal_dim, ksig)
    out = jax.block_until_ready(out)

    # sanity checks: shape, dtype, exact passthrough of x, finite random signal
    assert out.shape == (B, D + signal_dim), out.shape
    assert out.dtype == x.dtype
    assert bool(jnp.allclose(out[:, :D], x)), "concat copy mismatch"
    assert bool(jnp.all(jnp.isfinite(out))), "non-finite values in random signal"

    print("KERNEL_OK")
</pallas_src>

<mosaic_0001>
module attributes {stable_mosaic.version = 11 : i64} {
  func.func @_random_signal_kernel(%arg0: i32, %arg1: memref<2x16xf32, #tpu.memory_space<vmem>>, %arg2: memref<2x8xi32, #tpu.memory_space<vmem>>, %arg3: memref<2x24xf32, #tpu.memory_space<vmem>>) attributes {dimension_semantics = [#tpu.dimension_semantics<parallel>], iteration_bounds = array<i64: 1>, scalar_prefetch = 0 : i64, scratch_operands = 0 : i64, tpu.core_type = #tpu.core_type<tc>, window_params = [{transform_indices = @transform_0, window_bounds = array<i64: 2, 16>}, {transform_indices = @transform_1, window_bounds = array<i64: 2, 8>}, {transform_indices = @transform_2, window_bounds = array<i64: 2, 24>}]} {
    %c0 = arith.constant 0 : index
    %c0_0 = arith.constant 0 : index
    %0 = vector.load %arg1[%c0, %c0_0] : memref<2x16xf32, #tpu.memory_space<vmem>>, vector<2x16xf32>
    %c0_1 = arith.constant 0 : index
    %c0_2 = arith.constant 0 : index
    %1 = vector.load %arg3[%c0_1, %c0_2] : memref<2x24xf32, #tpu.memory_space<vmem>>, vector<2x16xf32>
    tpu.vector_store %arg3[%c0_1, %c0_2], %0 {strides = array<i32>} : memref<2x24xf32, #tpu.memory_space<vmem>>, vector<2x16xf32>,
    %c0_3 = arith.constant 0 : index
    %c0_4 = arith.constant 0 : index
    %2 = vector.load %arg2[%c0_3, %c0_4] : memref<2x8xi32, #tpu.memory_space<vmem>>, vector<2x4xi32>
    %c9_i32 = arith.constant 9 : i32
    %3 = vector.broadcast %c9_i32 : i32 to vector<2x4xi32>
    %4 = arith.shrui %2, %3 : vector<2x4xi32>
    %c1065353216_i32 = arith.constant 1065353216 : i32
    %5 = vector.broadcast %c1065353216_i32 : i32 to vector<2x4xi32>
    %6 = arith.ori %4, %5 : vector<2x4xi32>
    %7 = tpu.bitcast %6 : vector<2x4xi32> -> vector<2x4xf32>
    %c0_5 = arith.constant 0 : index
    %c4 = arith.constant 4 : index
    %8 = vector.load %arg2[%c0_5, %c4] : memref<2x8xi32, #tpu.memory_space<vmem>>, vector<2x4xi32>
    %c9_i32_6 = arith.constant 9 : i32
    %9 = vector.broadcast %c9_i32_6 : i32 to vector<2x4xi32>
    %10 = arith.shrui %8, %9 : vector<2x4xi32>
    %c1065353216_i32_7 = arith.constant 1065353216 : i32
    %11 = vector.broadcast %c1065353216_i32_7 : i32 to vector<2x4xi32>
    %12 = arith.ori %10, %11 : vector<2x4xi32>
    %13 = tpu.bitcast %12 : vector<2x4xi32> -> vector<2x4xf32>
    %cst = arith.constant 2.000000e+00 : f32
    %14 = vector.broadcast %cst : f32 to vector<2x4xf32>
    %15 = arith.subf %14, %7 : vector<2x4xf32>
    %cst_8 = arith.constant 1.000000e+00 : f32
    %16 = vector.broadcast %cst_8 : f32 to vector<2x4xf32>
    %17 = arith.subf %13, %16 : vector<2x4xf32>
    %18 = math.log %15 : vector<2x4xf32>
    %cst_9 = arith.constant -2.000000e+00 : f32
    %19 = vector.broadcast %cst_9 : f32 to vector<2x4xf32>
    %20 = arith.mulf %19, %18 : vector<2x4xf32>
    %21 = math.sqrt %20 : vector<2x4xf32>
    %cst_10 = arith.constant 6.28318548 : f32
    %22 = vector.broadcast %cst_10 : f32 to vector<2x4xf32>
    %23 = arith.mulf %22, %17 : vector<2x4xf32>
    %24 = math.cos %23 : vector<2x4xf32>
    %25 = arith.mulf %21, %24 : vector<2x4xf32>
    %26 = math.sin %23 : vector<2x4xf32>
    %27 = arith.mulf %21, %26 : vector<2x4xf32>
    %c0_11 = arith.constant 0 : index
    %c16 = arith.constant 16 : index
    %28 = vector.load %arg3[%c0_11, %c16] : memref<2x24xf32, #tpu.memory_space<vmem>>, vector<2x4xf32>
    tpu.vector_store %arg3[%c0_11, %c16], %25 {strides = array<i32>} : memref<2x24xf32, #tpu.memory_space<vmem>>, vector<2x4xf32>,
    %c0_12 = arith.constant 0 : index
    %c20 = arith.constant 20 : index
    %29 = vector.load %arg3[%c0_12, %c20] : memref<2x24xf32, #tpu.memory_space<vmem>>, vector<2x4xf32>
    tpu.vector_store %arg3[%c0_12, %c20], %27 {strides = array<i32>} : memref<2x24xf32, #tpu.memory_space<vmem>>, vector<2x4xf32>,
    return
  }
  func.func @transform_0(%arg0: i32) -> (i32, i32) {
    %c0_i32 = arith.constant 0 : i32
    %c0_i32_0 = arith.constant 0 : i32
    return %arg0, %c0_i32 : i32, i32
  }
  func.func @transform_1(%arg0: i32) -> (i32, i32) {
    %c0_i32 = arith.constant 0 : i32
    %c0_i32_0 = arith.constant 0 : i32
    return %arg0, %c0_i32 : i32, i32
  }
  func.func @transform_2(%arg0: i32) -> (i32, i32) {
    %c0_i32 = arith.constant 0 : i32
    %c0_i32_0 = arith.constant 0 : i32
    return %arg0, %c0_i32 : i32, i32
  }
}

</mosaic_0001>

<bundles_post_ra>
// kernel: tpu_custom_call.1
= control target key start
LH: loop header
LB: loop body
LE: loop exit
PB: predicated region body
PF: predicated region fallthrough
CT: control target
= control target key end

     0   :  { %7 = vsyncpa [#allocation3], 0  ;;  %s603_s0 = inlined_call_operand.hbm [shape: f32[2,16], index: 0, kind: input, shape index: {}]   ;;  %s604_s1 = inlined_call_operand.hbm [shape: u32[2,8], index: 1, kind: input, shape index: {}]   ;;  %s605_s2 = inlined_call_operand.hbm [shape: f32[2,24], index: 2, kind: output, shape index: {}]  }
   0x1   :  { %8 = vsyncpa [#allocation6], 0 }
   0x2   :  { %9 = vsyncpa [#allocation4], 0  ;;  %s15_s11 = sshll.u32 %s603_s0, 4  ;;  %s516_s12 = smov [#allocation2]   ;;  %s16_s11 = int_to_ptr.hbm [resolvable:$true] %s15_s11 }
   0x3   :  { %s17_s13 = sshll.u32 %s516_s12, 4  ;;  %s26_s16 = sshll.u32 %s604_s1, 4  ;;  %s18_s13 = int_to_ptr.vmem [resolvable:$true] %s17_s13  ;;  %s27_s16 = int_to_ptr.hbm [resolvable:$true] %s26_s16 }
   0x4   :  { %20 = dma.hbm_to_vmem [thread:$0]  %s16_s11, 32, %s18_s13, [#allocation3]  }
   0x5   :  { %s517_s17 = smov [#allocation5]  }
   0x6   :  { %s28_s18 = sshll.u32 %s517_s17, 4  ;;  %s29_s18 = int_to_ptr.vmem [resolvable:$true] %s28_s18 }
   0x7   :  { %31 = dma.hbm_to_vmem [thread:$0]  %s27_s16, 32, %s29_s18, [#allocation6]  }
   0x8   :  { %510 = dma.done.wait [#allocation3], 32  }
   0x9   :  { %511 = vsyncadd [#allocation3], 4294967264 }
   0xa   :  { %512 = dma.done.wait [#allocation6], 32  }
   0xb   :  { %513 = vsyncadd [#allocation6], 4294967264  ;;  %v43_v0 = vld [vmem:[#allocation5] sm:$0x3]  ;;  %v518_v16 = vmov 683565275  }
   0xc   :  { %v44_v1 = vshrl.u32 %v43_v0, 9  ;;  %v519_v18 = vmov 2475754826   ;;  %v520_v20 = vmov 2131351028   ;;  %s525_s0 = smov 124  }
   0xd   :  { %v521_v22 = vmov 2102212464   ;;  %v522_v24 = vmov 920167782   ;;  %v523_v30 = vmov 1326507024  }
   0xe   :  { %v550_v2 = vor.u32 1065353216, %v44_v1  ;;  %s526_s1 = smov 16   ;;  %s527_s19 = smov 20  }
   0xf   :  { %s528_s20 = smov [#allocation7]   ;;  %s403_s24 = sshll.u32 %s605_s2, 4  ;;  %s404_s24 = int_to_ptr.hbm [resolvable:$true] %s403_s24 }
  0x10   :  { %v414_v3 = vadd.f32 -1.0, %v550_v2  ;;  %s401_s21 = sshll.u32 %s528_s20, 4  ;;  %s402_s21 = int_to_ptr.vmem [resolvable:$true] %s401_s21 }
  0x12   :  { %v553_v4 = vmul.f32 6.2831855, %v414_v3 }
  0x14   :  { %v68_v5 = vand.u32 2139095040, %v553_v4  ;;  %v65_v7 = vand.u32 2147483647, %v553_v4  ;;  %vm67_vm12 = vcmp.lt.s32.totalorder %v553_v4, 0 }
  0x16   :  { %v69_v6 = vshrl.u32 %v68_v5, 23  ;;  %v72_v10 = vand.u32 8388607, %v65_v7  ;;  %vm66_vm13 = vcmp.le.f32.partialorder %v65_v7, 0.7853982 }
  0x18   :  { %v415_v8 = vadd.s32 4294967169, %v69_v6  ;;  %v73_v13 = vor.u32 8388608, %v72_v10  ;;  %v524_v6 = vmov 0  }
  0x1a   :  { %v75_v9 = vadd.s32 1, %v415_v8  ;;  %v562_v32 = vshll.u32 %v73_v13, 8 }
  0x1c   :  { %vm76_vm0 = vcmp.gt.s32.totalorder %v75_v9, 0  ;;  %v114_v44 = vand.u32 65535, %v562_v32  ;;  %v115_v45 = vshrl.u32 %v562_v32, 16 }
  0x1d   :  { %v77_v11 = vsel %vm76_vm0, %v75_v9, 0 }
  0x1e   :  { %v79_v12 = vand.u32 31, %v77_v11  ;;  %v559_v14 = vshrl.u32 %v77_v11, 5 }
  0x20   :  { %v80_v15 = vsub.s32 32, %v79_v12  ;;  %v82_v17 = vshll.u32 %v518_v16, %v79_v12  ;;  %v85_v19 = vshll.u32 %v519_v18, %v79_v12  ;;  %v88_v21 = vshll.u32 %v520_v20, %v79_v12 }
  0x21   :  { %v91_v23 = vshll.u32 %v521_v22, %v79_v12  ;;  %v94_v25 = vshll.u32 %v522_v24, %v79_v12  ;;  %vm97_vm1 = vcmp.lt.s32.totalorder %v559_v14, 1  ;;  %vm100_vm2 = vcmp.lt.s32.totalorder %v559_v14, 4 }
  0x22   :  { %v83_v26 = vshrl.u32 %v519_v18, %v80_v15  ;;  %v86_v27 = vshrl.u32 %v520_v20, %v80_v15  ;;  %v89_v28 = vshrl.u32 %v521_v22, %v80_v15  ;;  %v92_v29 = vshrl.u32 %v522_v24, %v80_v15 }
  0x23   :  { %v95_v31 = vshrl.u32 %v523_v30, %v80_v15  ;;  %vm99_vm3 = vcmp.lt.s32.totalorder %v559_v14, 3  ;;  %vm98_vm4 = vcmp.lt.s32.totalorder %v559_v14, 2  ;;  %v81_v52 = vshrl.u32 %v518_v16, %v80_v15 }
  0x24   :  { %v84_v33 = vor.u32 %v83_v26, %v82_v17  ;;  %v87_v34 = vor.u32 %v86_v27, %v85_v19  ;;  %v90_v35 = vor.u32 %v89_v28, %v88_v21  ;;  %v93_v36 = vor.u32 %v92_v29, %v91_v23 }
  0x25   :  { %v96_v37 = vor.u32 %v95_v31, %v94_v25 }
  0x26   :  { %v105_v38 = vsel %vm97_vm1, %v84_v33, %v87_v34  ;;  %v109_v39 = vsel %vm97_vm1, %v87_v34, %v90_v35  ;;  %v106_v40 = vsel %vm100_vm2, %v93_v36, 920167782  ;;  %v101_v1 = vsel %vm97_vm1, %v81_v52, %v84_v33 }
  0x27   :  { %v110_v41 = vsel %vm100_vm2, %v96_v37, 1326507024  ;;  %v107_v42 = vsel %vm99_vm3, %v90_v35, %v106_v40  ;;  %v102_v5 = vsel %vm100_vm2, %v90_v35, 2102212464  ;;  %vm208_vm1 = vweird.f32 %v553_v4 }
  0x28   :  { %v111_v43 = vsel %vm99_vm3, %v93_v36, %v110_v41  ;;  %v108_v46 = vsel %vm98_vm4, %v105_v38, %v107_v42  ;;  %v103_v17 = vsel %vm99_vm3, %v87_v34, %v102_v5 }
  0x29   :  { %v112_v47 = vsel %vm98_vm4, %v109_v39, %v111_v43  ;;  %v138_v50 = vand.u32 65535, %v108_v46  ;;  %v139_v51 = vshrl.u32 %v108_v46, 16  ;;  %v104_v25 = vsel %vm98_vm4, %v101_v1, %v103_v17 }
  0x2a   :  { %v116_v48 = vand.u32 65535, %v112_v47  ;;  %v117_v49 = vshrl.u32 %v112_v47, 16  ;;  %v158_v29 = vmul.u32 %v562_v32, %v104_v25  ;;  %v47_v25 = vsub.f32 2.0, %v550_v2 }
  0x2b   :  { %v140_v56 = vmul.u32 %v138_v50, %v114_v44  ;;  %v141_v57 = vmul.u32 %v139_v51, %v114_v44  ;;  %v142_v58 = vmul.u32 %v138_v50, %v115_v45  ;;  %v143_v62 = vmul.u32 %v139_v51, %v115_v45 }
  0x2c   :  { %v118_v53 = vmul.u32 %v116_v48, %v114_v44  ;;  %v119_v54 = vmul.u32 %v117_v49, %v114_v44  ;;  %v120_v55 = vmul.u32 %v116_v48, %v115_v45  ;;  %v121_v59 = vmul.u32 %v117_v49, %v115_v45 }
  0x2d   :  { %v144_v63 = vshll.u32 %v141_v57, 16  ;;  %v146_v0 = vshll.u32 %v142_v58, 16  ;;  %v145_v15 = vshrl.u32 %v141_v57, 16  ;;  %v147_v21 = vshrl.u32 %v142_v58, 16 }
  0x2e   :  { %v122_v60 = vshll.u32 %v119_v54, 16  ;;  %v124_v61 = vshll.u32 %v120_v55, 16  ;;  %v123_v10 = vshrl.u32 %v119_v54, 16  ;;  %v125_v18 = vshrl.u32 %v120_v55, 16 }
  0x2f   :  { %vm148_vm6 = vc.u32 %v140_v56, %v144_v63  ;;  %v150_v9 = vadd.s32 %v144_v63, %v140_v56  ;;  %434 = vlog2.f32 %v47_v25 }
  0x30   :  { %vm126_vm5 = vc.u32 %v118_v53, %v122_v60  ;;  %v128_v3 = vadd.s32 %v122_v60, %v118_v53  ;;  %v149_v12 = vsel %vm148_vm6, 1, %v524_v6 }
  0x31   :  { %v127_v8 = vsel %vm126_vm5, 1, %v524_v6  ;;  %v151_v16 = vadd.s32 %v149_v12, %v143_v62  ;;  %vm152_vm8 = vc.u32 %v150_v9, %v146_v0  ;;  %v154_v24 = vadd.s32 %v150_v9, %v146_v0 }
  0x32   :  { %v129_v11 = vadd.s32 %v127_v8, %v121_v59  ;;  %vm130_vm7 = vc.u32 %v128_v3, %v124_v61  ;;  %v153_v20 = vsel %vm152_vm8, 1, %v524_v6  ;;  %vm388_vm8 = vcmask 156800  }
  0x33   :  { %v131_v13 = vsel %vm130_vm7, 1, %v524_v6  ;;  %v155_v22 = vadd.s32 %v153_v20, %v151_v16  ;;  %vm41_vm7 = vcmask 123904  }
  0x34   :  { %v133_v19 = vadd.s32 %v131_v13, %v129_v11 }
  0x35   :  { %v156_v26 = vadd.s32 %v155_v22, %v145_v15 }
  0x36   :  { %v134_v23 = vadd.s32 %v133_v19, %v123_v10 }
  0x37   :  { %v157_v28 = vadd.s32 %v156_v26, %v147_v21  ;;  %v435_v26 = vpop.eup %434 }
  0x38   :  { %v135_v27 = vadd.s32 %v134_v23, %v125_v18 }
  0x39   :  { %v161_v30 = vadd.s32 1, %v157_v28 }
  0x3a   :  { %vm160_vm9 = vc.u32 %v135_v27, %v154_v24  ;;  %v159_v14 = vadd.s32 %v154_v24, %v135_v27  ;;  %v50_v27 = vmul.f32 0.6931472, %v435_v26 }
  0x3b   :  { %v162_v31 = vsel %vm160_vm9, %v161_v30, %v157_v28  ;;  %vm394_vm9 = vcmask 189600  }
  0x3c   :  { %v163_v33 = vadd.s32 %v162_v31, %v158_v29  ;;  %v51_v28 = vmul.f32 -2.0, %v50_v27 }
  0x3e   :  { %v164_v34 = vadd.s32 536870912, %v163_v33  ;;  %436 = vrsqrt.f32 %v51_v28  ;;  %vm59_vm5 = vcmp.eq.f32.partialorder %v51_v28, inf  ;;  %vm61_vm6 = vcmp.eq.f32.partialorder %v51_v28, 0.0 }
  0x40   :  { %v165_v35 = vshrl.u32 %v164_v34, 30 }
  0x42   :  { %v166_v36 = vshll.u32 %v165_v35, 30  ;;  %v189_v55 = vsub.s32 4, %v165_v35 }
  0x44   :  { %v167_v37 = vsub.s32 %v163_v33, %v166_v36  ;;  %v190_v60 = vsel %vm67_vm12, %v189_v55, %v165_v35  ;;  %v62_v36 = vand.u32 2147483648, %v51_v28 }
  0x45   :  { %v192_v63 = vsel %vm66_vm13, 0, %v190_v60 }
  0x46   :  { %vm168_vm10 = vcmp.lt.s32.totalorder %v167_v37, 0  ;;  %v169_v38 = vsub.s32 0, %v167_v37  ;;  %v209_v6 = vand.u32 3, %v192_v63  ;;  %v368_v8 = vadd.s32 3, %v192_v63 }
  0x48   :  { %v170_v39 = vsel %vm168_vm10, %v169_v38, %v167_v37  ;;  %vm214_vm14 = vcmp.eq.s32.totalorder %v209_v6, 2  ;;  %v369_v12 = vand.u32 3, %v368_v8  ;;  %vm211_vm15 = vcmp.eq.s32.totalorder %v209_v6, 0 }
  0x49   :  { %v171_v40 = vclz %v170_v39  ;;  %vm210_vm0 = vcmp.lt.s32.totalorder %v209_v6, 2 }
  0x4a   :  { %vm371_vm2 = vcmp.eq.s32.totalorder %v369_v12, 0  ;;  %vm374_vm3 = vcmp.eq.s32.totalorder %v369_v12, 2  ;;  %vm370_vm4 = vcmp.lt.s32.totalorder %v369_v12, 2 }
  0x4b   :  { %v416_v41 = vadd.s32 4294967294, %v171_v40 }
  0x4d   :  { %vm417_vm11 = vcmp.lt.s32.totalorder %v416_v41, 0 }
  0x4e   :  { %v174_v42 = vsel %vm417_vm11, 0, %v416_v41 }
  0x4f   :  { %v175_v43 = vsub.s32 32, %v174_v42  ;;  %v176_v44 = vshll.u32 %v167_v37, %v174_v42  ;;  %v179_v45 = vsub.s32 4294967266, %v174_v42 }
  0x51   :  { %v177_v32 = vshrl.u32 %v159_v14, %v175_v43  ;;  %v180_v46 = vadd.s32 127, %v179_v45  ;;  %v40_v14 = vld [vmem:[#allocation2] sm:$0x3] }
  0x52   :  { %42 = vst.msk [vmem:[#allocation7] sm:$0x3] %vm41_vm7, %v40_v14 }
  0x53   :  { %v178_v47 = vor.u32 %v177_v32, %v176_v44  ;;  %v181_v48 = vshll.u32 %v180_v46, 23 }
  0x55   :  { %v182_v49 = vor.u32 4788187, %v181_v48  ;;  %v185_v50 = vcvt.s32.f32 %v178_v47 }
  0x57   :  { %v183_v51 = vand.u32 2147483647, %v182_v49 }
  0x59   :  { %v186_v52 = vmul.f32 %v185_v50, %v183_v51 }
  0x5b   :  { %v187_v53 = vxor.u32 2147483648, %v186_v52 }
  0x5d   :  { %v188_v54 = vsel %vm67_vm12, %v187_v53, %v186_v52 }
  0x5e   :  { %v191_v56 = vsel %vm66_vm13, %v553_v4, %v188_v54  ;;  %v437_v4 = vpop.eup %436 }
  0x5f   :  { %v193_v57 = vmul.f32 %v191_v56, %v191_v56  ;;  %v53_v29 = vmul.f32 %v437_v4, %v51_v28 }
  0x61   :  { %v194_v58 = vmul.f32 -0.001358992, %v193_v57  ;;  %v201_v59 = vmul.f32 -0.00019511016, %v193_v57  ;;  %v54_v30 = vmul.f32 %v437_v4, %v53_v29 }
  0x63   :  { %v195_v61 = vadd.f32 0.041655596, %v194_v58  ;;  %v202_v62 = vadd.f32 0.008332121, %v201_v59  ;;  %v55_v31 = vmul.f32 0.5, %v54_v30 }
  0x65   :  { %v196_v0 = vmul.f32 %v195_v61, %v193_v57  ;;  %v203_v1 = vmul.f32 %v202_v62, %v193_v57  ;;  %v56_v33 = vsub.f32 1.5, %v55_v31 }
  0x67   :  { %v197_v3 = vadd.f32 -0.4999988, %v196_v0  ;;  %v204_v5 = vadd.f32 -0.16666654, %v203_v1  ;;  %v57_v34 = vmul.f32 %v437_v4, %v56_v33 }
  0x69   :  { %v198_v9 = vmul.f32 %v197_v3, %v193_v57  ;;  %v205_v7 = vmul.f32 %v204_v5, %v193_v57  ;;  %v58_v35 = vmul.f32 %v57_v34, %v51_v28 }
  0x6b   :  { %v199_v10 = vadd.f32 1.0, %v198_v9  ;;  %v206_v11 = vadd.f32 1.0, %v205_v7  ;;  %v60_v37 = vsel %vm59_vm5, %v51_v28, %v58_v35 }
  0x6c   :  { %v63_v38 = vsel %vm61_vm6, %v62_v36, %v60_v37 }
  0x6d   :  { %v207_v13 = vmul.f32 %v206_v11, %v191_v56  ;;  %v215_v15 = vxor.u32 2147483648, %v199_v10 }
  0x6f   :  { %v212_v16 = vxor.u32 2147483648, %v207_v13  ;;  %v216_v17 = vsel %vm214_vm14, %v215_v15, %v207_v13  ;;  %v376_v22 = vsel %vm374_vm3, %v215_v15, %v207_v13 }
  0x71   :  { %v213_v18 = vsel %vm211_vm15, %v199_v10, %v212_v16  ;;  %v373_v21 = vsel %vm371_vm2, %v199_v10, %v212_v16 }
  0x72   :  { %v217_v19 = vsel %vm210_vm0, %v213_v18, %v216_v17  ;;  %v377_v23 = vsel %vm370_vm4, %v373_v21, %v376_v22 }
  0x73   :  { %v218_v20 = vsel %vm208_vm1, nan, %v217_v19  ;;  %v378_v24 = vsel %vm208_vm1, nan, %v377_v23 }
  0x74   :  { %220 = vrot.lane.b32.xlu0 %v218_v20, %s525_s0 }
  0x7c   :  { %380 = vrot.lane.b32.xlu0 %v378_v24, %s525_s0 }
  0xe6   :  { %v221_v39 = vpop.permute.xlu0 %220 }
  0xe7   :  { %v223_v40 = vmul.f32 %v221_v39, %v63_v38 }
  0xe9   :  { %385 = vrot.lane.b32.xlu1 %v223_v40, %s526_s1 }
  0xee   :  { %v381_v2 = vpop.permute.xlu0 %380 }
  0xef   :  { %v383_v41 = vmul.f32 %v381_v2, %v63_v38 }
  0xf1   :  { %391 = vrot.lane.b32.xlu1 %v383_v41, %s527_s19 }
 0x15b   :  { %v386_v42 = vpop.permute.xlu1 %385 }
 0x15c   :  { %389 = vst.msk [vmem:[#allocation7] sm:$0x3] %vm388_vm8, %v386_v42 }
 0x163   :  { %v392_v43 = vpop.permute.xlu1 %391 }
 0x164   :  { %395 = vst.msk [vmem:[#allocation7] sm:$0x3] %vm394_vm9, %v392_v43 }
 0x165   :  { %406 = dma.vmem_to_hbm [thread:$0]  %s402_s21, 32, %s404_s24, [#allocation4]  }
 0x166   :  { %514 = dma.done.wait [#allocation4], 32  }
 0x167   :  { %515 = vsyncadd [#allocation4], 4294967264 }
 0x168   :  { %411 = vsyncpa [#allocation3], 1 }
 0x169   :  { %412 = vsyncpa [#allocation6], 1 }
 0x16a   :  { %413 = vsyncpa [#allocation4], 1 }

</bundles_post_ra>
